<compile_context>
chip_gen: v6e
topology: v6e:2x2x1
jax: 0.10.0
libtpu: 0.0.40
codegen_flags: <defaults>
</compile_context>

<pallas_src>
import functools

import jax
import jax.numpy as jnp
from jax import lax
from jax.experimental import pallas as pl
from jax.experimental.pallas import tpu as pltpu

IGNORE_INDEX = -100  # PyTorch nn.CrossEntropyLoss default


def _round_up(x, m):
    return ((x + m - 1) // m) * m


def _round_down(x, m):
    return (x // m) * m


def _ce_kernel(x_ref, t_ref, nll_ref, cnt_ref, *, n_valid, tn):
    """Per-tile cross entropy.

    x_ref:   (TN, C)  logits, native dtype, C = full (unpadded) class dim
    t_ref:   (TN, 1)  int32 targets
    nll_ref: (8, 128) f32 output slab, filled with this tile's sum of NLLs
    cnt_ref: (8, 128) f32 output slab, filled with this tile's valid-row count
    """
    i = pl.program_id(0)

    x = x_ref[...]                                   # (TN, C) native dtype
    t = t_ref[...]                                   # (TN, 1) int32

    # Row validity: inside the real batch AND not ignore_index. Rows past the
    # batch end (boundary block of the cdiv grid) hold garbage and are masked
    # out NaN-safely via jnp.where below.
    row = lax.broadcasted_iota(jnp.int32, (tn, 1), 0) + i * tn
    valid = (row < n_valid) & (t != IGNORE_INDEX)    # (TN, 1) bool

    # Target-logit gather in the native dtype (packed vregs for bf16); exactly
    # one non-zero term per row, so the sum is exact.
    col = lax.broadcasted_iota(jnp.int32, x.shape, 1)
    x_tgt = jnp.sum(jnp.where(col == t, x, jnp.zeros_like(x)),
                    axis=-1, keepdims=True)          # (TN, 1) native

    # Numerically-stable logsumexp: max is exact in the native dtype, the
    # shift / exp / sum / log run in f32. `s` is consumed only by exp.
    m = jnp.max(x, axis=-1, keepdims=True)           # (TN, 1) native
    m_f32 = m.astype(jnp.float32)
    s = x.astype(jnp.float32) - m_f32                # (TN, C) f32
    sum_exp = jnp.sum(jnp.exp(s), axis=-1, keepdims=True)          # (TN, 1)

    # per-row NLL = logsumexp(x) - x[target]
    nll = jnp.log(sum_exp) + (m_f32 - x_tgt.astype(jnp.float32))   # (TN, 1)

    vf = valid.astype(jnp.float32)
    nll_sum = jnp.sum(jnp.where(valid, nll, 0.0), axis=0, keepdims=True)  # (1,1)
    cnt_sum = jnp.sum(vf, axis=0, keepdims=True)                          # (1,1)

    nll_ref[...] = jnp.broadcast_to(nll_sum, (8, 128))
    cnt_ref[...] = jnp.broadcast_to(cnt_sum, (8, 128))


def _vmem_capacity_bytes():
    """Physical VMEM of the local TPU generation (fallback: v7x's 64 MiB)."""
    try:
        cap = getattr(pltpu.get_tpu_info(), "vmem_capacity_bytes", None)
        if cap:
            return int(cap)
    except Exception:
        pass
    return 64 << 20


def _choose_tn(n, c, itemsize, vmem_budget):
    """Batch tile: multiple of the sublane packing, sized so the
    double-buffered logits tile + f32 intermediates fit the VMEM budget."""
    row_align = 8 if itemsize >= 4 else 16
    c_lanes = _round_up(c, 128)
    # Per-row VMEM: 2x double-buffered native logits tile, ~2x f32
    # intermediates (s / exp(s)), 2x lane-padded int32 target column.
    per_row = 2 * c_lanes * itemsize + 2 * c_lanes * 4 + 2 * 128 * 4
    tn = max(row_align, vmem_budget // per_row)
    # Keep each logits DMA buffer <= 8 MiB and tiles <= 8192 rows.
    tn = min(tn, (8 << 20) // max(c_lanes * itemsize, 1), 8192)
    n_aligned = _round_up(n, row_align)
    tn = min(tn, n_aligned)
    tn = max(row_align, _round_down(tn, row_align))
    # v7x megacore: prefer >= 2 grid steps so the "parallel" axis can shard
    # across both TensorCores (no effect on single-TC v5e/v6e).
    if tn >= 2 * row_align and pl.cdiv(n, tn) < 2:
        tn = max(row_align, _round_up(pl.cdiv(n, 2), row_align))
    return tn


def cross_entropy_loss(logits, targets):
    """logits: (N, C) float, targets: (N,) int class indices -> scalar f32.
    Matches torch.nn.CrossEntropyLoss() (mean over non-ignored rows)."""
    n, c = logits.shape
    dtype = logits.dtype
    itemsize = jnp.dtype(dtype).itemsize

    vmem_cap = _vmem_capacity_bytes()
    vmem_limit = int(min(vmem_cap * 3 // 4, 96 << 20))
    tn = _choose_tn(n, c, itemsize, min(vmem_limit * 2 // 3, 32 << 20))
    num_tiles = pl.cdiv(n, tn)

    t2d = targets.astype(jnp.int32).reshape(n, 1)

    kernel = functools.partial(_ce_kernel, n_valid=n, tn=tn)

    c_lanes = _round_up(c, 128)
    cost = pl.CostEstimate(
        flops=6 * n * c_lanes,
        transcendentals=n * c_lanes + n,
        bytes_accessed=n * c * itemsize + n * 4 + num_tiles * 8 * 128 * 4 * 2,
    )

    nll_parts, cnt_parts = pl.pallas_call(
        kernel,
        grid=(num_tiles,),
        in_specs=[
            pl.BlockSpec((tn, c), lambda i: (i, 0)),   # logits, unpadded C
            pl.BlockSpec((tn, 1), lambda i: (i, 0)),   # targets
        ],
        out_specs=[
            pl.BlockSpec((8, 128), lambda i: (i, 0)),
            pl.BlockSpec((8, 128), lambda i: (i, 0)),
        ],
        out_shape=[
            jax.ShapeDtypeStruct((num_tiles * 8, 128), jnp.float32),
            jax.ShapeDtypeStruct((num_tiles * 8, 128), jnp.float32),
        ],
        compiler_params=pltpu.CompilerParams(
            dimension_semantics=("parallel",),
            vmem_limit_bytes=vmem_limit,
        ),
        cost_estimate=cost,
    )(logits, t2d)

    # Each tile broadcasts its scalar partials across an (8,128) slab; pick
    # one element per tile and finish the tiny mean reduction in XLA.
    nll_sum = jnp.sum(nll_parts[::8, 0])
    cnt_sum = jnp.sum(cnt_parts[::8, 0])
    return nll_sum / cnt_sum


if __name__ == "__main__":
    key = jax.random.PRNGKey(0)
    k1, k2, k3, k4 = jax.random.split(key, 4)

    # Test 1: batch=8, classes=32 (tile divides the batch exactly).
    N, C = 8, 32
    logits = jax.random.normal(k1, (N, C), dtype=jnp.float32)
    targets = jax.random.randint(k2, (N,), 0, C, dtype=jnp.int32)
    loss = cross_entropy_loss(logits, targets)
    jax.block_until_ready(loss)
    ref = -jnp.mean(jax.nn.log_softmax(logits, -1)[jnp.arange(N), targets])
    assert jnp.allclose(loss, ref, atol=1e-5, rtol=1e-5), (loss, ref)

    # Test 2: non-divisible batch + ignore_index rows (boundary-block path).
    N2, C2 = 13, 40
    logits2 = jax.random.normal(k3, (N2, C2), dtype=jnp.float32)
    targets2 = jax.random.randint(k4, (N2,), 0, C2, dtype=jnp.int32)
    targets2 = targets2.at[3].set(IGNORE_INDEX).at[10].set(IGNORE_INDEX)
    loss2 = cross_entropy_loss(logits2, targets2)
    jax.block_until_ready(loss2)
    lp2 = jax.nn.log_softmax(logits2, -1)
    picked = lp2[jnp.arange(N2), jnp.clip(targets2, 0, C2 - 1)]
    mask = targets2 != IGNORE_INDEX
    ref2 = -jnp.sum(jnp.where(mask, picked, 0.0)) / jnp.sum(mask)
    assert jnp.allclose(loss2, ref2, atol=1e-5, rtol=1e-5), (loss2, ref2)

    print("KERNEL_OK")
</pallas_src>

<mosaic_0001>
module attributes {stable_mosaic.version = 11 : i64} {
  func.func @_ce_kernel(%arg0: i32, %arg1: memref<8x32xf32, #tpu.memory_space<vmem>>, %arg2: memref<8x1xi32, #tpu.memory_space<vmem>>, %arg3: memref<8x128xf32, #tpu.memory_space<vmem>>, %arg4: memref<8x128xf32, #tpu.memory_space<vmem>>) attributes {dimension_semantics = [#tpu.dimension_semantics<parallel>], iteration_bounds = array<i64: 1>, scalar_prefetch = 0 : i64, scratch_operands = 0 : i64, tpu.core_type = #tpu.core_type<tc>, window_params = [{transform_indices = @transform_0, window_bounds = array<i64: 8, 32>}, {transform_indices = @transform_1, window_bounds = array<i64: 8, 1>}, {transform_indices = @transform_2, window_bounds = array<i64: 8, 128>}, {transform_indices = @transform_3, window_bounds = array<i64: 8, 128>}]} {
    %c0 = arith.constant 0 : index
    %c0_0 = arith.constant 0 : index
    %0 = vector.load %arg1[%c0, %c0_0] : memref<8x32xf32, #tpu.memory_space<vmem>>, vector<8x32xf32>
    %c0_1 = arith.constant 0 : index
    %c0_2 = arith.constant 0 : index
    %1 = vector.load %arg2[%c0_1, %c0_2] : memref<8x1xi32, #tpu.memory_space<vmem>>, vector<8x1xi32>
    %2 = tpu.iota {dimensions = array<i32: 0>} : vector<8x1xi32>
    %c8_i32 = arith.constant 8 : i32
    %3 = arith.muli %arg0, %c8_i32 : i32
    %4 = vector.broadcast %3 : i32 to vector<8x1xi32>
    %5 = arith.addi %2, %4 : vector<8x1xi32>
    %c8_i32_3 = arith.constant 8 : i32
    %6 = vector.broadcast %c8_i32_3 : i32 to vector<8x1xi32>
    %7 = arith.cmpi slt, %5, %6 : vector<8x1xi32>
    %c-100_i32 = arith.constant -100 : i32
    %8 = vector.broadcast %c-100_i32 : i32 to vector<8x1xi32>
    %9 = arith.cmpi ne, %1, %8 : vector<8x1xi32>
    %10 = arith.andi %7, %9 : vector<8x1xi1>
    %11 = tpu.iota {dimensions = array<i32: 1>} : vector<8x32xi32>
    %12 = vector.broadcast %1 : vector<8x1xi32> to vector<8x32xi32>
    %13 = arith.cmpi eq, %11, %12 : vector<8x32xi32>
    %cst = arith.constant 0.000000e+00 : f32
    %14 = vector.broadcast %cst : f32 to vector<8x32xf32>
    %15 = arith.select %13, %0, %14 : vector<8x32xi1>, vector<8x32xf32>
    %cst_4 = arith.constant dense<0.000000e+00> : vector<8xf32>
    %16 = vector.multi_reduction <add>, %15, %cst_4 [1] : vector<8x32xf32> to vector<8xf32>
    %17 = vector.shape_cast %16 : vector<8xf32> to vector<8x1xf32>
    %cst_5 = arith.constant dense<0xFF800000> : vector<8xf32>
    %18 = vector.multi_reduction <maximumf>, %0, %cst_5 [1] : vector<8x32xf32> to vector<8xf32>
    %19 = vector.shape_cast %18 : vector<8xf32> to vector<8x1xf32>
    %20 = vector.broadcast %19 : vector<8x1xf32> to vector<8x32xf32>
    %21 = arith.subf %0, %20 : vector<8x32xf32>
    %22 = math.exp %21 : vector<8x32xf32>
    %cst_6 = arith.constant dense<0.000000e+00> : vector<8xf32>
    %23 = vector.multi_reduction <add>, %22, %cst_6 [1] : vector<8x32xf32> to vector<8xf32>
    %24 = vector.shape_cast %23 : vector<8xf32> to vector<8x1xf32>
    %25 = math.log %24 : vector<8x1xf32>
    %26 = arith.subf %19, %17 : vector<8x1xf32>
    %27 = arith.addf %25, %26 : vector<8x1xf32>
    %28 = arith.extui %10 : vector<8x1xi1> to vector<8x1xi32>
    %29 = arith.sitofp %28 : vector<8x1xi32> to vector<8x1xf32>
    %cst_7 = arith.constant 0.000000e+00 : f32
    %30 = vector.broadcast %cst_7 : f32 to vector<8x1xf32>
    %31 = arith.select %10, %27, %30 : vector<8x1xi1>, vector<8x1xf32>
    %cst_8 = arith.constant dense<0.000000e+00> : vector<1xf32>
    %32 = vector.multi_reduction <add>, %31, %cst_8 [0] : vector<8x1xf32> to vector<1xf32>
    %33 = vector.shape_cast %32 : vector<1xf32> to vector<1x1xf32>
    %cst_9 = arith.constant dense<0.000000e+00> : vector<1xf32>
    %34 = vector.multi_reduction <add>, %29, %cst_9 [0] : vector<8x1xf32> to vector<1xf32>
    %35 = vector.shape_cast %34 : vector<1xf32> to vector<1x1xf32>
    %36 = vector.shape_cast %33 : vector<1x1xf32> to vector<1x1xf32>
    %37 = vector.broadcast %36 : vector<1x1xf32> to vector<8x128xf32>
    %c0_10 = arith.constant 0 : index
    %c0_11 = arith.constant 0 : index
    %38 = vector.load %arg3[%c0_10, %c0_11] : memref<8x128xf32, #tpu.memory_space<vmem>>, vector<8x128xf32>
    tpu.vector_store %arg3[%c0_10, %c0_11], %37 {strides = array<i32>} : memref<8x128xf32, #tpu.memory_space<vmem>>, vector<8x128xf32>,
    %39 = vector.shape_cast %35 : vector<1x1xf32> to vector<1x1xf32>
    %40 = vector.broadcast %39 : vector<1x1xf32> to vector<8x128xf32>
    %c0_12 = arith.constant 0 : index
    %c0_13 = arith.constant 0 : index
    %41 = vector.load %arg4[%c0_12, %c0_13] : memref<8x128xf32, #tpu.memory_space<vmem>>, vector<8x128xf32>
    tpu.vector_store %arg4[%c0_12, %c0_13], %40 {strides = array<i32>} : memref<8x128xf32, #tpu.memory_space<vmem>>, vector<8x128xf32>,
    return
  }
  func.func @transform_0(%arg0: i32) -> (i32, i32) {
    %c0_i32 = arith.constant 0 : i32
    %c0_i32_0 = arith.constant 0 : i32
    return %arg0, %c0_i32 : i32, i32
  }
  func.func @transform_1(%arg0: i32) -> (i32, i32) {
    %c0_i32 = arith.constant 0 : i32
    %c0_i32_0 = arith.constant 0 : i32
    return %arg0, %c0_i32 : i32, i32
  }
  func.func @transform_2(%arg0: i32) -> (i32, i32) {
    %c0_i32 = arith.constant 0 : i32
    %c0_i32_0 = arith.constant 0 : i32
    return %arg0, %c0_i32 : i32, i32
  }
  func.func @transform_3(%arg0: i32) -> (i32, i32) {
    %c0_i32 = arith.constant 0 : i32
    %c0_i32_0 = arith.constant 0 : i32
    return %arg0, %c0_i32 : i32, i32
  }
}

</mosaic_0001>

<bundles_post_ra>
// kernel: tpu_custom_call.1
= control target key start
LH: loop header
LB: loop body
LE: loop exit
PB: predicated region body
PF: predicated region fallthrough
CT: control target
= control target key end

     0   :  { %9 = vsyncpa [#allocation3], 0  ;;  %vm32_vm0 = vcmask 261120   ;;  %v162_v2 = vmov 0   ;;  %s201_s0 = inlined_call_operand.vmem [shape: f32[8,32], index: 0, kind: input, shape index: {}]   ;;  %s202_s1 = inlined_call_operand.vmem [shape: s32[8,1], index: 1, kind: input, shape index: {}]   ;;  %s203_s2 = inlined_call_operand.hbm [shape: f32[8,128], index: 2, kind: output, shape index: {0}]   ;;  %s204_s3 = inlined_call_operand.hbm [shape: f32[8,128], index: 3, kind: output, shape index: {1}]  }
   0x1   :  { %v15_v0 = vld [vmem:[%s201_s0] sm:$0xff]  ;;  %112 = vset.pattern.permute.xlu0 %v162_v2  ;;  %113 = vset.pattern.permute.xlu1 %v162_v2 }
   0x2   :  { %v36_v1 = vsel %vm32_vm0, %v15_v0, -inf }
   0x3   :  { %10 = vsyncpa [#allocation5], 0  ;;  %37 = vmax.xlane.f32.xlu0 %v36_v1  ;;  %v16_v3 = vld [vmem:[%s202_s1] sm:$0xff]  ;;  %v25_v7 = vlaneseq  ;;  %v163_v15 = vmov 0.0   ;;  %vm52_vm3 = vcmask 7168   ;;  %s164_s0 = smov [#allocation2]  }
   0x4   :  { %vm23_vm2 = vcmp.ne.s32.totalorder %v16_v3, 4294967196  ;;  %s85_s1 = sshll.u32 %s164_s0, 4  ;;  %s165_s16 = smov [#allocation4]   ;;  %s86_s1 = int_to_ptr.vmem [resolvable:$true] %s85_s1 }
   0x5   :  { %v26_v8 = vand.u32 127, %v25_v7  ;;  %v107_v16 = vsel %vm23_vm2, 1.0, %v163_v15  ;;  %s95_s17 = sshll.u32 %s165_s16, 4  ;;  %s118_s18 = scalar_lea.vmem %s86_s1, 128  ;;  %s96_s17 = int_to_ptr.vmem [resolvable:$true] %s95_s17 }
   0x6   :  { %v60_v17 = vsel %vm52_vm3, %v107_v16, 0.0  ;;  %p119_p0 = scmp.ne.s32.totalorder %s86_s1, %s118_s18  ;;  %p123_p1 = scmp.lt.s32.totalorder %s86_s1, %s86_s1 }
   0x7   :  { %v61_v19 = vrot.slane %v60_v17, 4  ;;  %p124_p2 = scmp.lt.s32.totalorder %s118_s18, %s118_s18 }
   0x9   :  { %v62_v23 = vadd.f32 %v61_v19, %v60_v17  ;;  %p125_p3 = por %p124_p2, %p123_p1 }
   0xb   :  { %v63_v27 = vrot.slane %v62_v23, 2  ;;  %p126_p4 = pnand %p125_p3, %p119_p0 }
   0xd   :  { %v64_v31 = vadd.f32 %v63_v27, %v62_v23 }
   0xf   :  { %v65_v34 = vrot.slane %v64_v31, 1 }
  0x11   :  { %v66_v36 = vadd.f32 %v65_v34, %v64_v31 }
  0x19   :  { %28 = vperm.xlu0 %112, %v16_v3  }
  0x8c   :  { %v38_v4 = vpop.xlane.xlu0 %37 }
  0x8d   :  { %v39_v5 = vsub.f32 %v15_v0, %v38_v4 }
  0x8f   :  { %v40_v6 = vmul.f32 1.442695, %v39_v5 }
  0x91   :  { %114 = vpow2.f32 %v40_v6 }
  0x94   :  { %v29_v9 = vpop.permute.xlu0 %28 }
  0x95   :  { %vm30_vm1 = vcmp.eq.s32.totalorder %v26_v8, %v29_v9 }
  0x96   :  { %v31_v11 = vsel %vm30_vm1, %v15_v0, 0.0 }
  0x97   :  { %v33_v13 = vsel %vm32_vm0, %v31_v11, 0.0 }
  0x9e   :  { %v115_v10 = vpop.eup %114 }
  0x9f   :  { %v42_v12 = vsel %vm32_vm0, %v115_v10, 0.0 }
  0xa0   :  { %43 = vadd.xlane.f32.xlu1 %v42_v12 }
  0xa4   :  { %34 = vadd.xlane.f32.xlu1 %v33_v13 }
 0x129   :  { %v44_v14 = vpop.xlane.xlu1 %43 }
 0x12a   :  { %116 = vlog2.f32 %v44_v14 }
 0x12d   :  { %v35_v18 = vpop.xlane.xlu1 %34 }
 0x12e   :  { %v47_v22 = vsub.f32 %v38_v4, %v35_v18 }
 0x137   :  { %v117_v20 = vpop.eup %116 }
 0x138   :  { %v46_v21 = vmul.f32 0.6931472, %v117_v20 }
 0x13a   :  { %v48_v24 = vadd.f32 %v47_v22, %v46_v21 }
 0x13c   :  { %v51_v25 = vsel %vm23_vm2, %v48_v24, 0.0 }
 0x13d   :  { %v53_v26 = vsel %vm52_vm3, %v51_v25, 0.0 }
 0x13e   :  { %v54_v28 = vrot.slane %v53_v26, 4 }
 0x140   :  { %v55_v29 = vadd.f32 %v54_v28, %v53_v26 }
 0x142   :  { %v56_v30 = vrot.slane %v55_v29, 2 }
 0x144   :  { %v57_v32 = vadd.f32 %v56_v30, %v55_v29 }
 0x146   :  { %v58_v33 = vrot.slane %v57_v32, 1 }
 0x148   :  { %v59_v35 = vadd.f32 %v58_v33, %v57_v32 }
 0x14a   :  { %69 = vperm.xlu1 %113, %v59_v35  }
 0x14e   :  { %75 = vperm.xlu1 %113, %v66_v36  }
 0x1c5   :  { %v70_v37 = vpop.permute.xlu1 %69 }
 0x1c6   :  { %72 = vst [vmem:[#allocation2] sm:$0xff] %v70_v37 }
 0x1c7   :  { %129 = shalt.err (!%p126_p4)
}
 0x1c8   :  { %88 = dma.vmem_to_hbm [thread:$0]  %s86_s1, 128, %s203_s2, [#allocation3]  }
 0x1c9   :  { %v76_v38 = vpop.permute.xlu1 %75  ;;  %s138_s21 = scalar_lea.vmem %s96_s17, 128  ;;  %p143_p6 = scmp.lt.s32.totalorder %s96_s17, %s96_s17 }
 0x1ca   :  { %78 = vst [vmem:[#allocation4] sm:$0xff] %v76_v38  ;;  %p139_p5 = scmp.ne.s32.totalorder %s96_s17, %s138_s21  ;;  %p144_p7 = scmp.lt.s32.totalorder %s138_s21, %s138_s21 }
 0x1cc   :  { %p145_p8 = por %p144_p7, %p143_p6 }
 0x1ce   :  { %p146_p9 = pnand %p145_p8, %p139_p5 }
 0x1d0   :  { %149 = shalt.err (!%p146_p9)
}
 0x1d1   :  { %98 = dma.vmem_to_hbm [thread:$0]  %s96_s17, 128, %s204_s3, [#allocation5]  }
 0x1d2   :  { %158 = dma.done.wait [#allocation3], 128  }
 0x1d3   :  { %159 = vsyncadd [#allocation3], 4294967168 }
 0x1d4   :  { %160 = dma.done.wait [#allocation5], 128  }
 0x1d5   :  { %161 = vsyncadd [#allocation5], 4294967168 }
 0x1d6   :  { %105 = vsyncpa [#allocation3], 1 }
 0x1d7   :  { %106 = vsyncpa [#allocation5], 1 }

</bundles_post_ra>
